<compile_context>
chip_gen: v5e
topology: v5e:2x2
jax: 0.10.0
libtpu: 0.0.40
codegen_flags: <defaults>
</compile_context>

<pallas_src>
import functools

import jax
import jax.numpy as jnp
from jax.experimental import pallas as pl
from jax.experimental.pallas import tpu as pltpu

HIDDEN = 64  # per-head hidden width; packed hidden is 2*HIDDEN = 128 lanes


def _round_up(x, m):
    return ((x + m - 1) // m) * m


# --------------------------------------------------------------------------- #
# Kernel
# --------------------------------------------------------------------------- #
def _actor_critic_kernel(continuous, action_dim, compute_dtype,
                         x_ref,
                         w1_ref, b1_ref, w2_ref, b2_ref, w3_ref, b3_ref,
                         actor_ref, value_ref):
    x = x_ref[...].astype(compute_dtype)

    # Layer 1: packed actor|critic -> (TB, 128); f32 accumulate, activation in
    # compute_dtype (bf16 tanh on v6e/v7x when enabled, f32 otherwise).
    h = jnp.dot(x, w1_ref[...], preferred_element_type=jnp.float32) + b1_ref[...]
    h = jnp.tanh(h.astype(compute_dtype))

    # Layer 2: block-diagonal packed -> (TB, 128)
    h = jnp.dot(h, w2_ref[...], preferred_element_type=jnp.float32) + b2_ref[...]
    h = jnp.tanh(h.astype(compute_dtype))

    # Layer 3: packed heads -> (TB, OUT_W) = [logits | value | zeros], f32
    y = jnp.dot(h, w3_ref[...], preferred_element_type=jnp.float32) + b3_ref[...]

    # Value head: its own narrow f32 output (keeps PPO value targets in f32).
    value_ref[...] = y[:, action_dim:action_dim + 1].astype(value_ref.dtype)

    if continuous:
        # Actor lanes need tanh; extra lanes are sliced off in the wrapper.
        actor_ref[...] = jnp.tanh(y).astype(actor_ref.dtype)
    else:
        # Softmax over the actor lanes only (value/pad lanes masked out), f32.
        lane = jax.lax.broadcasted_iota(jnp.int32, y.shape, dimension=1)
        is_actor = lane < action_dim
        logits = jnp.where(is_actor, y, -1e30)
        m = jnp.max(logits, axis=-1, keepdims=True)
        e = jnp.exp(logits - m)
        s = jnp.sum(e, axis=-1, keepdims=True)
        r = pl.reciprocal(s, approx=True)
        r = r * (2.0 - s * r)  # one Newton step -> near-exact, still EUP-fed
        actor_ref[...] = (e * r).astype(actor_ref.dtype)


# --------------------------------------------------------------------------- #
# Parameter handling
# --------------------------------------------------------------------------- #
def init_params(key, state_dim, action_dim):
    """Torch-nn.Linear-like uniform fan-in init; weights stored (in, out)."""
    def linear(k, fan_in, fan_out):
        kw, kb = jax.random.split(k)
        bound = 1.0 / jnp.sqrt(fan_in)
        w = jax.random.uniform(kw, (fan_in, fan_out), jnp.float32, -bound, bound)
        b = jax.random.uniform(kb, (1, fan_out), jnp.float32, -bound, bound)
        return w, b

    keys = jax.random.split(key, 6)
    aw1, ab1 = linear(keys[0], state_dim, HIDDEN)
    aw2, ab2 = linear(keys[1], HIDDEN, HIDDEN)
    aw3, ab3 = linear(keys[2], HIDDEN, action_dim)
    cw1, cb1 = linear(keys[3], state_dim, HIDDEN)
    cw2, cb2 = linear(keys[4], HIDDEN, HIDDEN)
    cw3, cb3 = linear(keys[5], HIDDEN, 1)
    return dict(aw1=aw1, ab1=ab1, aw2=aw2, ab2=ab2, aw3=aw3, ab3=ab3,
                cw1=cw1, cb1=cb1, cw2=cw2, cb2=cb2, cw3=cw3, cb3=cb3)


def pack_params(params, use_bf16=False):
    """Pack actor+critic weights into 128-wide matrices for the fused kernel.

    use_bf16=True is recommended on v6e/v7x (bf16 MXU inputs + bf16 tanh/EUP +
    bf16 actor output slab); keep False on v5e (no bf16 VPU/EUP path).
    """
    state_dim = params["aw1"].shape[0]
    action_dim = params["aw3"].shape[1]
    out_w = _round_up(action_dim + 1, 128)     # lane-dense fused actor width

    w1 = jnp.concatenate([params["aw1"], params["cw1"]], axis=1)   # (S, 128)
    b1 = jnp.concatenate([params["ab1"], params["cb1"]], axis=1)   # (1, 128)

    w2 = jnp.zeros((2 * HIDDEN, 2 * HIDDEN), jnp.float32)
    w2 = w2.at[:HIDDEN, :HIDDEN].set(params["aw2"])
    w2 = w2.at[HIDDEN:, HIDDEN:].set(params["cw2"])
    b2 = jnp.concatenate([params["ab2"], params["cb2"]], axis=1)   # (1, 128)

    w3 = jnp.zeros((2 * HIDDEN, out_w), jnp.float32)
    w3 = w3.at[:HIDDEN, :action_dim].set(params["aw3"])
    w3 = w3.at[HIDDEN:, action_dim:action_dim + 1].set(params["cw3"])
    b3 = jnp.zeros((1, out_w), jnp.float32)
    b3 = b3.at[:, :action_dim].set(params["ab3"][0])
    b3 = b3.at[:, action_dim:action_dim + 1].set(params["cb3"][0])

    wdt = jnp.bfloat16 if use_bf16 else jnp.float32
    return dict(w1=w1.astype(wdt), b1=b1,
                w2=w2.astype(wdt), b2=b2,
                w3=w3.astype(wdt), b3=b3,
                state_dim=state_dim, action_dim=action_dim, out_w=out_w,
                use_bf16=use_bf16)


# --------------------------------------------------------------------------- #
# Batch-tile selection
# --------------------------------------------------------------------------- #
def _choose_batch_tile(B, block_b):
    """Pick (tb, b_pad).

    Goals: large tiles (amortize ~0.35 us/step pipeline overhead), >= 2 grid
    steps when B >= 16 (so the "parallel" batch axis uses both v7x
    TensorCores), and tiles that divide B exactly whenever possible so no
    jnp.pad copy of the state array is needed.
    """
    if B < 16:
        tb = max(8, _round_up(B, 8))
        return tb, tb                           # single step; pad <= 7 rows
    max_tb = min(block_b, _round_up(B, 8) // 2)  # ensure >= 2 steps
    max_tb = max(8, (max_tb // 8) * 8)
    # Prefer the largest multiple-of-8 divisor of B (no padding, no copy).
    for cand in range(max_tb, 7, -8):
        if B % cand == 0:
            if 4 * cand >= max_tb:              # reject pathologically small tiles
                return cand, B
            break
    # Fallback: near-max tile with a small padded tail.
    nsteps = max(2, pl.cdiv(B, block_b))
    tb = min(max_tb, _round_up(pl.cdiv(B, nsteps), 8))
    return tb, _round_up(B, tb)


# --------------------------------------------------------------------------- #
# Wrapper
# --------------------------------------------------------------------------- #
def actor_critic_forward(state, packed, has_continuous_action_space,
                         *, block_b=2048):
    """Returns (actor_out, state_values).

    actor_out: (B, action_dim) — tanh(mean) if continuous, softmax probs otherwise.
    state_values: (B, 1), float32.
    """
    B, state_dim = state.shape
    action_dim = packed["action_dim"]
    out_w = packed["out_w"]
    use_bf16 = packed["use_bf16"]
    compute_dtype = jnp.bfloat16 if use_bf16 else jnp.float32
    actor_dtype = jnp.bfloat16 if use_bf16 else jnp.float32

    # Pre-cast the state at the call boundary so the input DMA moves bf16 bytes.
    if use_bf16 and state.dtype != jnp.bfloat16:
        state = state.astype(jnp.bfloat16)

    tb, b_pad = _choose_batch_tile(B, block_b)
    if b_pad != B:
        state = jnp.pad(state, ((0, b_pad - B), (0, 0)))

    grid = (b_pad // tb,)
    kernel = functools.partial(_actor_critic_kernel,
                               bool(has_continuous_action_space),
                               action_dim, compute_dtype)

    wbytes = 2 if use_bf16 else 4
    weight_bytes = (packed["w1"].size + packed["w2"].size + packed["w3"].size) * wbytes \
                   + (packed["b1"].size + packed["b2"].size + packed["b3"].size) * 4
    in_bytes = b_pad * state_dim * (2 if use_bf16 else 4)
    out_bytes = b_pad * out_w * (2 if use_bf16 else 4) + b_pad * 4
    cost = pl.CostEstimate(
        flops=int(2 * b_pad * (state_dim * 2 * HIDDEN
                               + (2 * HIDDEN) ** 2
                               + 2 * HIDDEN * out_w)),
        transcendentals=int(b_pad * (2 * 2 * HIDDEN + out_w)),
        bytes_accessed=int(in_bytes + out_bytes + weight_bytes),
    )

    cp_kwargs = dict(dimension_semantics=("parallel",))  # megacore batch shard (v7x)
    if tb > 2048:
        # Large tiles can exceed v5e's 16 MiB scoped-VMEM default.
        cp_kwargs["vmem_limit_bytes"] = 64 * 1024 * 1024
    compiler_params = pltpu.CompilerParams(**cp_kwargs)

    out_shape = (jax.ShapeDtypeStruct((b_pad, out_w), actor_dtype),
                 jax.ShapeDtypeStruct((b_pad, 1), jnp.float32))
    out_specs = (pl.BlockSpec((tb, out_w), lambda i: (i, 0)),
                 pl.BlockSpec((tb, 1), lambda i: (i, 0)))

    def _const_spec(shape, single_buffer):
        if single_buffer:
            # Weights never change across grid steps -> single-buffer them.
            return pl.BlockSpec(shape, lambda i: (0, 0),
                                pipeline_mode=pl.Buffered(1))
        return pl.BlockSpec(shape, lambda i: (0, 0))

    def _build(single_buffer_weights):
        in_specs = [pl.BlockSpec((tb, state_dim), lambda i: (i, 0))]
        for name in ("w1", "b1", "w2", "b2", "w3", "b3"):
            in_specs.append(_const_spec(packed[name].shape, single_buffer_weights))
        return pl.pallas_call(
            kernel,
            grid=grid,
            in_specs=in_specs,
            out_specs=out_specs,
            out_shape=out_shape,
            compiler_params=compiler_params,
            cost_estimate=cost,
        )

    args = (state, packed["w1"], packed["b1"], packed["w2"], packed["b2"],
            packed["w3"], packed["b3"])
    try:
        actor_slab, value_col = _build(True)(*args)
    except Exception:
        # Fallback if this jax build rejects pl.Buffered(1) for pallas_call
        # operands; double-buffered weights cost ~200 KiB extra VMEM only.
        actor_slab, value_col = _build(False)(*args)

    actor_out = actor_slab[:B, :action_dim]
    values = value_col[:B, :]
    return actor_out, values


def evaluate_continuous(state, action, packed, action_var):
    """ActorCritic.evaluate() semantics for the continuous-action branch
    (MultivariateNormal with diagonal covariance diag(action_var))."""
    action_mean, state_values = actor_critic_forward(state, packed, True)
    action_mean = action_mean.astype(jnp.float32)
    k = action_mean.shape[-1]
    log_var = jnp.log(action_var)
    diff = action - action_mean
    logprob = (-0.5 * jnp.sum(diff * diff / action_var, axis=-1)
               - 0.5 * k * jnp.log(2.0 * jnp.pi)
               - 0.5 * jnp.sum(log_var))
    entropy = 0.5 * k * (1.0 + jnp.log(2.0 * jnp.pi)) + 0.5 * jnp.sum(log_var)
    entropy = jnp.broadcast_to(entropy, logprob.shape)
    return logprob, state_values, entropy


# --------------------------------------------------------------------------- #
# Pure-JAX reference (correctness check)
# --------------------------------------------------------------------------- #
def _ref_forward(state, params, continuous):
    h = jnp.tanh(state @ params["aw1"] + params["ab1"])
    h = jnp.tanh(h @ params["aw2"] + params["ab2"])
    logits = h @ params["aw3"] + params["ab3"]
    actor = jnp.tanh(logits) if continuous else jax.nn.softmax(logits, axis=-1)
    c = jnp.tanh(state @ params["cw1"] + params["cb1"])
    c = jnp.tanh(c @ params["cw2"] + params["cb2"])
    v = c @ params["cw3"] + params["cb3"]
    return actor, v


# --------------------------------------------------------------------------- #
# Demo / self-test
# --------------------------------------------------------------------------- #
if __name__ == "__main__":
    B, state_dim, action_dim = 8, 32, 8
    action_std_init = 0.6

    key = jax.random.PRNGKey(0)
    k_params, k_state, k_action, k_state2 = jax.random.split(key, 4)

    params = init_params(k_params, state_dim, action_dim)
    packed = pack_params(params, use_bf16=False)  # set True on v6e/v7x
    state = jax.random.normal(k_state, (B, state_dim), jnp.float32)
    action = jax.random.normal(k_action, (B, action_dim), jnp.float32)
    action_var = jnp.full((action_dim,), action_std_init * action_std_init,
                          jnp.float32)

    # Continuous-action branch (actor ends in Tanh), as in act()/evaluate().
    action_mean, state_values = actor_critic_forward(state, packed, True)
    logprob, values, entropy = evaluate_continuous(state, action, packed,
                                                   action_var)

    # Discrete-action branch (actor ends in Softmax).
    probs, values_d = actor_critic_forward(state, packed, False)

    # Larger batch exercises the multi-step (>=2 grid programs) tiling path.
    B2 = 64
    state2 = jax.random.normal(k_state2, (B2, state_dim), jnp.float32)
    mean2, vals2 = actor_critic_forward(state2, packed, True)

    jax.block_until_ready((action_mean, state_values, logprob, values, entropy,
                           probs, values_d, mean2, vals2))

    # Shape / sanity checks
    assert action_mean.shape == (B, action_dim)
    assert state_values.shape == (B, 1)
    assert probs.shape == (B, action_dim)
    assert values_d.shape == (B, 1)
    assert mean2.shape == (B2, action_dim)
    assert vals2.shape == (B2, 1)
    assert jnp.all(jnp.isfinite(action_mean))
    assert jnp.allclose(jnp.sum(probs, axis=-1), 1.0, atol=1e-4)

    # Numerical check against a pure-JAX reference of the original module.
    ref_mean, ref_val = _ref_forward(state, params, True)
    ref_probs, ref_val_d = _ref_forward(state, params, False)
    ref_mean2, ref_val2 = _ref_forward(state2, params, True)
    assert jnp.allclose(action_mean, ref_mean, atol=1e-4, rtol=1e-4)
    assert jnp.allclose(state_values, ref_val, atol=1e-4, rtol=1e-4)
    assert jnp.allclose(probs, ref_probs, atol=1e-4, rtol=1e-4)
    assert jnp.allclose(values_d, ref_val_d, atol=1e-4, rtol=1e-4)
    assert jnp.allclose(mean2, ref_mean2, atol=1e-4, rtol=1e-4)
    assert jnp.allclose(vals2, ref_val2, atol=1e-4, rtol=1e-4)

    print("KERNEL_OK")
</pallas_src>

<mosaic_0001>
module attributes {stable_mosaic.version = 11 : i64} {
  func.func @_actor_critic_kernel(%arg0: i32, %arg1: memref<8x32xf32, #tpu.memory_space<vmem>>, %arg2: memref<32x128xf32, #tpu.memory_space<vmem>>, %arg3: memref<1x128xf32, #tpu.memory_space<vmem>>, %arg4: memref<128x128xf32, #tpu.memory_space<vmem>>, %arg5: memref<1x128xf32, #tpu.memory_space<vmem>>, %arg6: memref<128x128xf32, #tpu.memory_space<vmem>>, %arg7: memref<1x128xf32, #tpu.memory_space<vmem>>, %arg8: memref<8x128xf32, #tpu.memory_space<vmem>>, %arg9: memref<8x1xf32, #tpu.memory_space<vmem>>) attributes {dimension_semantics = [#tpu.dimension_semantics<parallel>], iteration_bounds = array<i64: 1>, scalar_prefetch = 0 : i64, scratch_operands = 0 : i64, tpu.core_type = #tpu.core_type<tc>, window_params = [{transform_indices = @transform_0, window_bounds = array<i64: 8, 32>}, {pipeline_mode = #tpu.pipeline_mode<synchronous>, transform_indices = @transform_1, window_bounds = array<i64: 32, 128>}, {pipeline_mode = #tpu.pipeline_mode<synchronous>, transform_indices = @transform_2, window_bounds = array<i64: 1, 128>}, {pipeline_mode = #tpu.pipeline_mode<synchronous>, transform_indices = @transform_3, window_bounds = array<i64: 128, 128>}, {pipeline_mode = #tpu.pipeline_mode<synchronous>, transform_indices = @transform_4, window_bounds = array<i64: 1, 128>}, {pipeline_mode = #tpu.pipeline_mode<synchronous>, transform_indices = @transform_5, window_bounds = array<i64: 128, 128>}, {pipeline_mode = #tpu.pipeline_mode<synchronous>, transform_indices = @transform_6, window_bounds = array<i64: 1, 128>}, {transform_indices = @transform_7, window_bounds = array<i64: 8, 128>}, {transform_indices = @transform_8, window_bounds = array<i64: 8, 1>}]} {
    %c0 = arith.constant 0 : index
    %c0_0 = arith.constant 0 : index
    %0 = vector.load %arg1[%c0, %c0_0] : memref<8x32xf32, #tpu.memory_space<vmem>>, vector<8x32xf32>
    %c0_1 = arith.constant 0 : index
    %c0_2 = arith.constant 0 : index
    %1 = vector.load %arg2[%c0_1, %c0_2] : memref<32x128xf32, #tpu.memory_space<vmem>>, vector<32x128xf32>
    %cst = arith.constant dense<0.000000e+00> : vector<8x128xf32>
    %2 = tpu.matmul %0, %1, %cst {dimension_numbers = #tpu.dot_dimension_numbers<[1], [0], [0], [1], [0, 0, 1, 1], [], []>} : vector<8x32xf32>, vector<32x128xf32>, vector<8x128xf32> -> vector<8x128xf32>
    %c0_3 = arith.constant 0 : index
    %c0_4 = arith.constant 0 : index
    %3 = vector.load %arg3[%c0_3, %c0_4] : memref<1x128xf32, #tpu.memory_space<vmem>>, vector<1x128xf32>
    %4 = vector.broadcast %3 : vector<1x128xf32> to vector<8x128xf32>
    %5 = arith.addf %2, %4 : vector<8x128xf32>
    %6 = math.tanh %5 : vector<8x128xf32>
    %c0_5 = arith.constant 0 : index
    %c0_6 = arith.constant 0 : index
    %7 = vector.load %arg4[%c0_5, %c0_6] : memref<128x128xf32, #tpu.memory_space<vmem>>, vector<128x128xf32>
    %cst_7 = arith.constant dense<0.000000e+00> : vector<8x128xf32>
    %8 = tpu.matmul %6, %7, %cst_7 {dimension_numbers = #tpu.dot_dimension_numbers<[1], [0], [0], [1], [0, 0, 1, 1], [], []>} : vector<8x128xf32>, vector<128x128xf32>, vector<8x128xf32> -> vector<8x128xf32>
    %c0_8 = arith.constant 0 : index
    %c0_9 = arith.constant 0 : index
    %9 = vector.load %arg5[%c0_8, %c0_9] : memref<1x128xf32, #tpu.memory_space<vmem>>, vector<1x128xf32>
    %10 = vector.broadcast %9 : vector<1x128xf32> to vector<8x128xf32>
    %11 = arith.addf %8, %10 : vector<8x128xf32>
    %12 = math.tanh %11 : vector<8x128xf32>
    %c0_10 = arith.constant 0 : index
    %c0_11 = arith.constant 0 : index
    %13 = vector.load %arg6[%c0_10, %c0_11] : memref<128x128xf32, #tpu.memory_space<vmem>>, vector<128x128xf32>
    %cst_12 = arith.constant dense<0.000000e+00> : vector<8x128xf32>
    %14 = tpu.matmul %12, %13, %cst_12 {dimension_numbers = #tpu.dot_dimension_numbers<[1], [0], [0], [1], [0, 0, 1, 1], [], []>} : vector<8x128xf32>, vector<128x128xf32>, vector<8x128xf32> -> vector<8x128xf32>
    %c0_13 = arith.constant 0 : index
    %c0_14 = arith.constant 0 : index
    %15 = vector.load %arg7[%c0_13, %c0_14] : memref<1x128xf32, #tpu.memory_space<vmem>>, vector<1x128xf32>
    %16 = vector.broadcast %15 : vector<1x128xf32> to vector<8x128xf32>
    %17 = arith.addf %14, %16 : vector<8x128xf32>
    %18 = vector.extract_strided_slice %17 {offsets = [0, 8], sizes = [8, 1], strides = [1, 1]} : vector<8x128xf32> to vector<8x1xf32>
    %c0_15 = arith.constant 0 : index
    %c0_16 = arith.constant 0 : index
    %19 = vector.load %arg9[%c0_15, %c0_16] : memref<8x1xf32, #tpu.memory_space<vmem>>, vector<8x1xf32>
    tpu.vector_store %arg9[%c0_15, %c0_16], %18 {strides = array<i32>} : memref<8x1xf32, #tpu.memory_space<vmem>>, vector<8x1xf32>,
    %20 = math.tanh %17 : vector<8x128xf32>
    %c0_17 = arith.constant 0 : index
    %c0_18 = arith.constant 0 : index
    %21 = vector.load %arg8[%c0_17, %c0_18] : memref<8x128xf32, #tpu.memory_space<vmem>>, vector<8x128xf32>
    tpu.vector_store %arg8[%c0_17, %c0_18], %20 {strides = array<i32>} : memref<8x128xf32, #tpu.memory_space<vmem>>, vector<8x128xf32>,
    return
  }
  func.func @transform_0(%arg0: i32) -> (i32, i32) {
    %c0_i32 = arith.constant 0 : i32
    %c0_i32_0 = arith.constant 0 : i32
    return %arg0, %c0_i32 : i32, i32
  }
  func.func @transform_1(%arg0: i32) -> (i32, i32) {
    %c0_i32 = arith.constant 0 : i32
    %c0_i32_0 = arith.constant 0 : i32
    %c0_i32_1 = arith.constant 0 : i32
    return %c0_i32, %c0_i32_0 : i32, i32
  }
  func.func @transform_2(%arg0: i32) -> (i32, i32) {
    %c0_i32 = arith.constant 0 : i32
    %c0_i32_0 = arith.constant 0 : i32
    %c0_i32_1 = arith.constant 0 : i32
    return %c0_i32, %c0_i32_0 : i32, i32
  }
  func.func @transform_3(%arg0: i32) -> (i32, i32) {
    %c0_i32 = arith.constant 0 : i32
    %c0_i32_0 = arith.constant 0 : i32
    %c0_i32_1 = arith.constant 0 : i32
    return %c0_i32, %c0_i32_0 : i32, i32
  }
  func.func @transform_4(%arg0: i32) -> (i32, i32) {
    %c0_i32 = arith.constant 0 : i32
    %c0_i32_0 = arith.constant 0 : i32
    %c0_i32_1 = arith.constant 0 : i32
    return %c0_i32, %c0_i32_0 : i32, i32
  }
  func.func @transform_5(%arg0: i32) -> (i32, i32) {
    %c0_i32 = arith.constant 0 : i32
    %c0_i32_0 = arith.constant 0 : i32
    %c0_i32_1 = arith.constant 0 : i32
    return %c0_i32, %c0_i32_0 : i32, i32
  }
  func.func @transform_6(%arg0: i32) -> (i32, i32) {
    %c0_i32 = arith.constant 0 : i32
    %c0_i32_0 = arith.constant 0 : i32
    %c0_i32_1 = arith.constant 0 : i32
    return %c0_i32, %c0_i32_0 : i32, i32
  }
  func.func @transform_7(%arg0: i32) -> (i32, i32) {
    %c0_i32 = arith.constant 0 : i32
    %c0_i32_0 = arith.constant 0 : i32
    return %arg0, %c0_i32 : i32, i32
  }
  func.func @transform_8(%arg0: i32) -> (i32, i32) {
    %c0_i32 = arith.constant 0 : i32
    %c0_i32_0 = arith.constant 0 : i32
    return %arg0, %c0_i32 : i32, i32
  }
}

module attributes {stable_mosaic.version = 11 : i64} {
  func.func @_actor_critic_kernel(%arg0: i32, %arg1: memref<8x32xf32, #tpu.memory_space<vmem>>, %arg2: memref<32x128xf32, #tpu.memory_space<vmem>>, %arg3: memref<1x128xf32, #tpu.memory_space<vmem>>, %arg4: memref<128x128xf32, #tpu.memory_space<vmem>>, %arg5: memref<1x128xf32, #tpu.memory_space<vmem>>, %arg6: memref<128x128xf32, #tpu.memory_space<vmem>>, %arg7: memref<1x128xf32, #tpu.memory_space<vmem>>, %arg8: memref<8x128xf32, #tpu.memory_space<vmem>>, %arg9: memref<8x1xf32, #tpu.memory_space<vmem>>) attributes {dimension_semantics = [#tpu.dimension_semantics<parallel>], iteration_bounds = array<i64: 1>, scalar_prefetch = 0 : i64, scratch_operands = 0 : i64, tpu.core_type = #tpu.core_type<tc>, window_params = [{transform_indices = @transform_0, window_bounds = array<i64: 8, 32>}, {pipeline_mode = #tpu.pipeline_mode<synchronous>, transform_indices = @transform_1, window_bounds = array<i64: 32, 128>}, {pipeline_mode = #tpu.pipeline_mode<synchronous>, transform_indices = @transform_2, window_bounds = array<i64: 1, 128>}, {pipeline_mode = #tpu.pipeline_mode<synchronous>, transform_indices = @transform_3, window_bounds = array<i64: 128, 128>}, {pipeline_mode = #tpu.pipeline_mode<synchronous>, transform_indices = @transform_4, window_bounds = array<i64: 1, 128>}, {pipeline_mode = #tpu.pipeline_mode<synchronous>, transform_indices = @transform_5, window_bounds = array<i64: 128, 128>}, {pipeline_mode = #tpu.pipeline_mode<synchronous>, transform_indices = @transform_6, window_bounds = array<i64: 1, 128>}, {transform_indices = @transform_7, window_bounds = array<i64: 8, 128>}, {transform_indices = @transform_8, window_bounds = array<i64: 8, 1>}]} {
    %c0 = arith.constant 0 : index
    %c0_0 = arith.constant 0 : index
    %0 = vector.load %arg1[%c0, %c0_0] : memref<8x32xf32, #tpu.memory_space<vmem>>, vector<8x32xf32>
    %c0_1 = arith.constant 0 : index
    %c0_2 = arith.constant 0 : index
    %1 = vector.load %arg2[%c0_1, %c0_2] : memref<32x128xf32, #tpu.memory_space<vmem>>, vector<32x128xf32>
    %cst = arith.constant dense<0.000000e+00> : vector<8x128xf32>
    %2 = tpu.matmul %0, %1, %cst {dimension_numbers = #tpu.dot_dimension_numbers<[1], [0], [0], [1], [0, 0, 1, 1], [], []>} : vector<8x32xf32>, vector<32x128xf32>, vector<8x128xf32> -> vector<8x128xf32>
    %c0_3 = arith.constant 0 : index
    %c0_4 = arith.constant 0 : index
    %3 = vector.load %arg3[%c0_3, %c0_4] : memref<1x128xf32, #tpu.memory_space<vmem>>, vector<1x128xf32>
    %4 = vector.broadcast %3 : vector<1x128xf32> to vector<8x128xf32>
    %5 = arith.addf %2, %4 : vector<8x128xf32>
    %6 = math.tanh %5 : vector<8x128xf32>
    %c0_5 = arith.constant 0 : index
    %c0_6 = arith.constant 0 : index
    %7 = vector.load %arg4[%c0_5, %c0_6] : memref<128x128xf32, #tpu.memory_space<vmem>>, vector<128x128xf32>
    %cst_7 = arith.constant dense<0.000000e+00> : vector<8x128xf32>
    %8 = tpu.matmul %6, %7, %cst_7 {dimension_numbers = #tpu.dot_dimension_numbers<[1], [0], [0], [1], [0, 0, 1, 1], [], []>} : vector<8x128xf32>, vector<128x128xf32>, vector<8x128xf32> -> vector<8x128xf32>
    %c0_8 = arith.constant 0 : index
    %c0_9 = arith.constant 0 : index
    %9 = vector.load %arg5[%c0_8, %c0_9] : memref<1x128xf32, #tpu.memory_space<vmem>>, vector<1x128xf32>
    %10 = vector.broadcast %9 : vector<1x128xf32> to vector<8x128xf32>
    %11 = arith.addf %8, %10 : vector<8x128xf32>
    %12 = math.tanh %11 : vector<8x128xf32>
    %c0_10 = arith.constant 0 : index
    %c0_11 = arith.constant 0 : index
    %13 = vector.load %arg6[%c0_10, %c0_11] : memref<128x128xf32, #tpu.memory_space<vmem>>, vector<128x128xf32>
    %cst_12 = arith.constant dense<0.000000e+00> : vector<8x128xf32>
    %14 = tpu.matmul %12, %13, %cst_12 {dimension_numbers = #tpu.dot_dimension_numbers<[1], [0], [0], [1], [0, 0, 1, 1], [], []>} : vector<8x128xf32>, vector<128x128xf32>, vector<8x128xf32> -> vector<8x128xf32>
    %c0_13 = arith.constant 0 : index
    %c0_14 = arith.constant 0 : index
    %15 = vector.load %arg7[%c0_13, %c0_14] : memref<1x128xf32, #tpu.memory_space<vmem>>, vector<1x128xf32>
    %16 = vector.broadcast %15 : vector<1x128xf32> to vector<8x128xf32>
    %17 = arith.addf %14, %16 : vector<8x128xf32>
    %18 = vector.extract_strided_slice %17 {offsets = [0, 8], sizes = [8, 1], strides = [1, 1]} : vector<8x128xf32> to vector<8x1xf32>
    %c0_15 = arith.constant 0 : index
    %c0_16 = arith.constant 0 : index
    %19 = vector.load %arg9[%c0_15, %c0_16] : memref<8x1xf32, #tpu.memory_space<vmem>>, vector<8x1xf32>
    tpu.vector_store %arg9[%c0_15, %c0_16], %18 {strides = array<i32>} : memref<8x1xf32, #tpu.memory_space<vmem>>, vector<8x1xf32>,
    %20 = math.tanh %17 : vector<8x128xf32>
    %c0_17 = arith.constant 0 : index
    %c0_18 = arith.constant 0 : index
    %21 = vector.load %arg8[%c0_17, %c0_18] : memref<8x128xf32, #tpu.memory_space<vmem>>, vector<8x128xf32>
    tpu.vector_store %arg8[%c0_17, %c0_18], %20 {strides = array<i32>} : memref<8x128xf32, #tpu.memory_space<vmem>>, vector<8x128xf32>,
    return
  }
  func.func @transform_0(%arg0: i32) -> (i32, i32) {
    %c0_i32 = arith.constant 0 : i32
    %c0_i32_0 = arith.constant 0 : i32
    return %arg0, %c0_i32 : i32, i32
  }
  func.func @transform_1(%arg0: i32) -> (i32, i32) {
    %c0_i32 = arith.constant 0 : i32
    %c0_i32_0 = arith.constant 0 : i32
    %c0_i32_1 = arith.constant 0 : i32
    return %c0_i32, %c0_i32_0 : i32, i32
  }
  func.func @transform_2(%arg0: i32) -> (i32, i32) {
    %c0_i32 = arith.constant 0 : i32
    %c0_i32_0 = arith.constant 0 : i32
    %c0_i32_1 = arith.constant 0 : i32
    return %c0_i32, %c0_i32_0 : i32, i32
  }
  func.func @transform_3(%arg0: i32) -> (i32, i32) {
    %c0_i32 = arith.constant 0 : i32
    %c0_i32_0 = arith.constant 0 : i32
    %c0_i32_1 = arith.constant 0 : i32
    return %c0_i32, %c0_i32_0 : i32, i32
  }
  func.func @transform_4(%arg0: i32) -> (i32, i32) {
    %c0_i32 = arith.constant 0 : i32
    %c0_i32_0 = arith.constant 0 : i32
    %c0_i32_1 = arith.constant 0 : i32
    return %c0_i32, %c0_i32_0 : i32, i32
  }
  func.func @transform_5(%arg0: i32) -> (i32, i32) {
    %c0_i32 = arith.constant 0 : i32
    %c0_i32_0 = arith.constant 0 : i32
    %c0_i32_1 = arith.constant 0 : i32
    return %c0_i32, %c0_i32_0 : i32, i32
  }
  func.func @transform_6(%arg0: i32) -> (i32, i32) {
    %c0_i32 = arith.constant 0 : i32
    %c0_i32_0 = arith.constant 0 : i32
    %c0_i32_1 = arith.constant 0 : i32
    return %c0_i32, %c0_i32_0 : i32, i32
  }
  func.func @transform_7(%arg0: i32) -> (i32, i32) {
    %c0_i32 = arith.constant 0 : i32
    %c0_i32_0 = arith.constant 0 : i32
    return %arg0, %c0_i32 : i32, i32
  }
  func.func @transform_8(%arg0: i32) -> (i32, i32) {
    %c0_i32 = arith.constant 0 : i32
    %c0_i32_0 = arith.constant 0 : i32
    return %arg0, %c0_i32 : i32, i32
  }
}

</mosaic_0001>

<bundles_post_ra>
// kernel: tpu_custom_call.1
= control target key start
LH: loop header
LB: loop body
LE: loop exit
PB: predicated region body
PF: predicated region fallthrough
CT: control target
= control target key end

     0   :  { %14 = vsyncpa [#allocation3], 0  ;;  %s462_s0 = inlined_call_operand.hbm [shape: f32[8,32], index: 0, kind: input, shape index: {}]   ;;  %s463_s1 = inlined_call_operand.hbm [shape: f32[32,128], index: 1, kind: input, shape index: {}]   ;;  %s464_s2 = inlined_call_operand.vmem [shape: f32[1,128], index: 2, kind: input, shape index: {}]   ;;  %s465_s3 = inlined_call_operand.hbm [shape: f32[128,128], index: 3, kind: input, shape index: {}]   ;;  %s466_s4 = inlined_call_operand.vmem [shape: f32[1,128], index: 4, kind: input, shape index: {}]   ;;  %s467_s5 = inlined_call_operand.hbm [shape: f32[128,128], index: 5, kind: input, shape index: {}]   ;;  %s468_s6 = inlined_call_operand.vmem [shape: f32[1,128], index: 6, kind: input, shape index: {}]   ;;  %s469_s7 = inlined_call_operand.hbm [shape: f32[8,128], index: 7, kind: output, shape index: {0}]   ;;  %s470_s8 = inlined_call_operand.vmem [shape: f32[8,1], index: 8, kind: output, shape index: {1}]  }
   0x1   :  { %15 = vsyncpa [#allocation6], 0 }
   0x2   :  { %16 = vsyncpa [#allocation9], 0  ;;  %s33_s29 = sshll.u32 %s463_s1, 4  ;;  %s34_s29 = int_to_ptr.hbm [resolvable:$true] %s33_s29 }
   0x3   :  { %17 = vsyncpa [#allocation4], 0  ;;  %s382_s30 = smov [#allocation5]   ;;  %s23_s12 = sshll.u32 %s462_s0, 4  ;;  %s24_s12 = int_to_ptr.hbm [resolvable:$true] %s23_s12 }
   0x4   :  { %s35_s9 = sshll.u32 %s382_s30, 4  ;;  %s383_s13 = smov 128   ;;  %s36_s9 = int_to_ptr.vmem [resolvable:$true] %s35_s9 }
   0x5   :  { %s384_s14 = smov 8   ;;  %s385_s15 = smov [#allocation2]  }
   0x6   :  { %41 = dma.hbm_to_vmem [thread:$0]  %s34_s29, 512, %s36_s9, [#allocation6], %s383_s13, %s383_s13, %s384_s14  }
   0x7   :  { %s25_s16 = sshll.u32 %s385_s15, 4  ;;  %s48_s19 = sshll.u32 %s465_s3, 4  ;;  %s26_s16 = int_to_ptr.vmem [resolvable:$true] %s25_s16  ;;  %s49_s19 = int_to_ptr.hbm [resolvable:$true] %s48_s19 }
   0x8   :  { %28 = dma.hbm_to_vmem [thread:$0]  %s24_s12, 128, %s26_s16, [#allocation3]  }
   0x9   :  { %s63_s21 = sshll.u32 %s467_s5, 4  ;;  %s386_s22 = smov [#allocation7]   ;;  %s64_s21 = int_to_ptr.hbm [resolvable:$true] %s63_s21 }
   0xa   :  { %s50_s23 = sshll.u32 %s386_s22, 4  ;;  %s387_s0 = smov [#allocation8]   ;;  %s51_s23 = int_to_ptr.vmem [resolvable:$true] %s50_s23 }
   0xb   :  { %56 = dma.hbm_to_vmem [thread:$0]  %s49_s19, 2048, %s51_s23, [#allocation6], %s383_s13, %s383_s13, %s384_s14  }
   0xc   :  { %s65_s24 = sshll.u32 %s387_s0, 4  ;;  %s66_s24 = int_to_ptr.vmem [resolvable:$true] %s65_s24 }
   0xd   :  { %71 = dma.hbm_to_vmem [thread:$0]  %s64_s21, 2048, %s66_s24, [#allocation9], %s383_s13, %s383_s13, %s384_s14  }
   0xe   :  { %374 = dma.done.wait [#allocation3], 128  }
   0xf   :  { %375 = vsyncadd [#allocation3], 4294967168 }
  0x10   :  { %376 = dma.done.wait [#allocation6], 2560  }
  0x11   :  { %377 = vsyncadd [#allocation6], 4294964736 }
  0x12   :  { %378 = dma.done.wait [#allocation9], 2048  }
  0x13   :  { %379 = vsyncadd [#allocation9], 4294965248  ;;  %v94_v0 = vld [vmem:[#allocation5 + $0x18] sm:$0xff]  ;;  %v93_v1 = vld [vmem:[#allocation5 + $0x10] sm:$0xff]  ;;  %vm99_vm0 = vcmask 261120   ;;  %s388_s28 = smov 120  }
  0x14   :  { %115 = vmatpush.msra.mxu0 %v94_v0  ;;  %v139_v2 = vld [vmem:[#allocation7 + $0x78] sm:$0xff]  ;;  %v92_v3 = vld [vmem:[#allocation5 + $0x8] sm:$0xff]  ;;  %v138_v4 = vld [vmem:[#allocation7 + $0x70] sm:$0xff]  ;;  %s389_s29 = smov [#allocation10]   ;;  %vm209_vm1 = vcmask 7168  }
  0x15   :  { %144 = vmatpush.msra.mxu1 %v139_v2  ;;  %v137_v5 = vld [vmem:[#allocation7 + $0x68] sm:$0xff]  ;;  %v91_v6 = vld [vmem:[#allocation5] sm:$0xff]  ;;  %v90_v7 = vld [vmem:[#allocation2] sm:$0xff]  ;;  %s218_s30 = sshll.u32 %s389_s29, 4  ;;  %s219_s30 = int_to_ptr.vmem [resolvable:$true] %s218_s30 }
  0x16   :  { %116 = vmatpush.msra.mxu0 %v93_v1  ;;  %v136_v8 = vld [vmem:[#allocation7 + $0x60] sm:$0xff]  ;;  %v135_v9 = vld [vmem:[#allocation7 + $0x58] sm:$0xff]  ;;  %v134_v10 = vld [vmem:[#allocation7 + $0x50] sm:$0xff] }
  0x17   :  { %145 = vmatpush.msra.mxu1 %v138_v4  ;;  %v133_v11 = vld [vmem:[#allocation7 + $0x48] sm:$0xff]  ;;  %v132_v12 = vld [vmem:[#allocation7 + $0x40] sm:$0xff]  ;;  %v131_v13 = vld [vmem:[#allocation7 + $0x38] sm:$0xff] }
  0x18   :  { %117 = vmatpush.msra.mxu0 %v92_v3  ;;  %v130_v14 = vld [vmem:[#allocation7 + $0x30] sm:$0xff]  ;;  %v129_v15 = vld [vmem:[#allocation7 + $0x28] sm:$0xff]  ;;  %v128_v16 = vld [vmem:[#allocation7 + $0x20] sm:$0xff] }
  0x19   :  { %146 = vmatpush.msra.mxu1 %v137_v5  ;;  %v127_v17 = vld [vmem:[#allocation7 + $0x18] sm:$0xff]  ;;  %v126_v18 = vld [vmem:[#allocation7 + $0x10] sm:$0xff]  ;;  %v125_v19 = vld [vmem:[#allocation7 + $0x8] sm:$0xff] }
  0x1a   :  { %118 = vmatpush.msra.mxu0 %v91_v6  ;;  %v124_v20 = vld [vmem:[#allocation7] sm:$0xff]  ;;  %v180_v21 = vld [vmem:[#allocation8 + $0x78] sm:$0xff]  ;;  %v179_v22 = vld [vmem:[#allocation8 + $0x70] sm:$0xff] }
  0x1b   :  { %236 = vmatmul.msk.f32.vlgmr.msra.gmra.mxu0 %vm99_vm0, %v90_v7  ;;  %147 = vmatpush.msra.mxu1 %v136_v8  ;;  %v178_v23 = vld [vmem:[#allocation8 + $0x68] sm:$0xff]  ;;  %v177_v24 = vld [vmem:[#allocation8 + $0x60] sm:$0xff]  ;;  %v176_v25 = vld [vmem:[#allocation8 + $0x58] sm:$0xff] }
  0x1c   :  { %185 = vmatpush.msra.mxu2 %v180_v21  ;;  %v175_v26 = vld [vmem:[#allocation8 + $0x50] sm:$0xff]  ;;  %v174_v27 = vld [vmem:[#allocation8 + $0x48] sm:$0xff]  ;;  %v173_v28 = vld [vmem:[#allocation8 + $0x40] sm:$0xff] }
  0x1d   :  { %148 = vmatpush.msra.mxu1 %v135_v9  ;;  %v172_v29 = vld [vmem:[#allocation8 + $0x38] sm:$0xff]  ;;  %v171_v30 = vld [vmem:[#allocation8 + $0x30] sm:$0xff]  ;;  %v170_v31 = vld [vmem:[#allocation8 + $0x28] sm:$0xff] }
  0x1e   :  { %186 = vmatpush.msra.mxu2 %v179_v22  ;;  %v245_v32 = vld [vmem:[%s464_s2] ss:$0 sm:$0xff]  ;;  %v169_v36 = vld [vmem:[#allocation8 + $0x20] sm:$0xff]  ;;  %v167_v38 = vld [vmem:[#allocation8 + $0x10] sm:$0xff] }
  0x1f   :  { %149 = vmatpush.msra.mxu1 %v134_v10  ;;  %v168_v37 = vld [vmem:[#allocation8 + $0x18] sm:$0xff]  ;;  %v166_v39 = vld [vmem:[#allocation8 + $0x8] sm:$0xff]  ;;  %v165_v40 = vld [vmem:[#allocation8] sm:$0xff] }
  0x20   :  { %187 = vmatpush.msra.mxu2 %v178_v23  ;;  %v246_v41 = vld [vmem:[%s466_s4] ss:$0 sm:$0xff]  ;;  %s220_s4 = sshll.u32 %s469_s7, 4  ;;  %s221_s4 = int_to_ptr.hbm [resolvable:$true] %s220_s4 }
  0x21   :  { %150 = vmatpush.msra.mxu1 %v133_v11  ;;  %v247_v45 = vld [vmem:[%s468_s6] ss:$0 sm:$0xff] }
  0x22   :  { %188 = vmatpush.msra.mxu2 %v177_v24 }
  0x23   :  { %151 = vmatpush.msra.mxu1 %v132_v12 }
  0x24   :  { %189 = vmatpush.msra.mxu2 %v176_v25 }
  0x25   :  { %152 = vmatpush.msra.mxu1 %v131_v13 }
  0x26   :  { %190 = vmatpush.msra.mxu2 %v175_v26 }
  0x27   :  { %153 = vmatpush.msra.mxu1 %v130_v14 }
  0x28   :  { %191 = vmatpush.msra.mxu2 %v174_v27 }
  0x29   :  { %154 = vmatpush.msra.mxu1 %v129_v15 }
  0x2a   :  { %192 = vmatpush.msra.mxu2 %v173_v28 }
  0x2b   :  { %155 = vmatpush.msra.mxu1 %v128_v16 }
  0x2c   :  { %193 = vmatpush.msra.mxu2 %v172_v29 }
  0x2d   :  { %156 = vmatpush.msra.mxu1 %v127_v17 }
  0x2e   :  { %194 = vmatpush.msra.mxu2 %v171_v30 }
  0x2f   :  { %157 = vmatpush.msra.mxu1 %v126_v18 }
  0x30   :  { %195 = vmatpush.msra.mxu2 %v170_v31 }
  0x31   :  { %158 = vmatpush.msra.mxu1 %v125_v19 }
  0x32   :  { %196 = vmatpush.msra.mxu2 %v169_v36 }
  0x33   :  { %159 = vmatpush.msra.mxu1 %v124_v20 }
  0x34   :  { %197 = vmatpush.msra.mxu2 %v168_v37 }
  0x36   :  { %198 = vmatpush.msra.mxu2 %v167_v38 }
  0x38   :  { %199 = vmatpush.msra.mxu2 %v166_v39 }
  0x3a   :  { %200 = vmatpush.msra.mxu2 %v165_v40 }
  0x98   :  { %v120_v33 = vpop.f32.mrf.mxu0 }
  0x99   :  { %v121_v34 = vadd.f32 %v245_v32, %v120_v33 }
  0x9b   :  { %248 = vtanh.f32 %v121_v34 }
  0xa1   :  { %v249_v35 = vpop.eup %248 }
  0xa2   :  { %160 = vmatmul.f32.vlgmr.msra.gmra.mxu1 %v249_v35 }
 0x11f   :  { %v161_v42 = vpop.f32.mrf.mxu1 }
 0x120   :  { %v162_v43 = vadd.f32 %v246_v41, %v161_v42 }
 0x122   :  { %250 = vtanh.f32 %v162_v43 }
 0x128   :  { %v251_v44 = vpop.eup %250 }
 0x129   :  { %201 = vmatmul.f32.vlgmr.msra.gmra.mxu2 %v251_v44 }
 0x1ac   :  { %v202_v46 = vpop.f32.mrf.mxu2 }
 0x1ad   :  { %v203_v47 = vadd.f32 %v247_v45, %v202_v46 }
 0x1af   :  { %252 = vtanh.f32 %v203_v47  ;;  %206 = vrot.lane.b32.xlu0 %v203_v47, %s388_s28 }
 0x1b5   :  { %v253_v48 = vpop.eup %252 }
 0x1b6   :  { %212 = vst [vmem:[#allocation10] sm:$0xff] %v253_v48 }
 0x1b7   :  { %223 = dma.vmem_to_hbm [thread:$0]  %s219_s30, 128, %s221_s4, [#allocation4]  }
 0x221   :  { %v207_v49 = vpop.permute.xlu0 %206 }
 0x222   :  { %210 = vst.msk [vmem:[%s470_s8] sm:$0xff] %vm209_vm1, %v207_v49 }
 0x223   :  { %380 = dma.done.wait [#allocation4], 128  }
 0x224   :  { %381 = vsyncadd [#allocation4], 4294967168 }
 0x225   :  { %232 = vsyncpa [#allocation3], 1 }
 0x226   :  { %233 = vsyncpa [#allocation6], 1 }
 0x227   :  { %234 = vsyncpa [#allocation9], 1 }
 0x228   :  { %235 = vsyncpa [#allocation4], 1 }

// kernel: tpu_custom_call.1
= control target key start
LH: loop header
LB: loop body
LE: loop exit
PB: predicated region body
PF: predicated region fallthrough
CT: control target
= control target key end

     0   :  { %14 = vsyncpa [#allocation3], 0  ;;  %s462_s0 = inlined_call_operand.hbm [shape: f32[8,32], index: 0, kind: input, shape index: {}]   ;;  %s463_s1 = inlined_call_operand.hbm [shape: f32[32,128], index: 1, kind: input, shape index: {}]   ;;  %s464_s2 = inlined_call_operand.vmem [shape: f32[1,128], index: 2, kind: input, shape index: {}]   ;;  %s465_s3 = inlined_call_operand.hbm [shape: f32[128,128], index: 3, kind: input, shape index: {}]   ;;  %s466_s4 = inlined_call_operand.vmem [shape: f32[1,128], index: 4, kind: input, shape index: {}]   ;;  %s467_s5 = inlined_call_operand.hbm [shape: f32[128,128], index: 5, kind: input, shape index: {}]   ;;  %s468_s6 = inlined_call_operand.vmem [shape: f32[1,128], index: 6, kind: input, shape index: {}]   ;;  %s469_s7 = inlined_call_operand.hbm [shape: f32[8,128], index: 7, kind: output, shape index: {0}]   ;;  %s470_s8 = inlined_call_operand.vmem [shape: f32[8,1], index: 8, kind: output, shape index: {1}]  }
   0x1   :  { %15 = vsyncpa [#allocation6], 0 }
   0x2   :  { %16 = vsyncpa [#allocation9], 0  ;;  %s33_s29 = sshll.u32 %s463_s1, 4  ;;  %s34_s29 = int_to_ptr.hbm [resolvable:$true] %s33_s29 }
   0x3   :  { %17 = vsyncpa [#allocation4], 0  ;;  %s382_s30 = smov [#allocation5]   ;;  %s23_s12 = sshll.u32 %s462_s0, 4  ;;  %s24_s12 = int_to_ptr.hbm [resolvable:$true] %s23_s12 }
   0x4   :  { %s35_s9 = sshll.u32 %s382_s30, 4  ;;  %s383_s13 = smov 128   ;;  %s36_s9 = int_to_ptr.vmem [resolvable:$true] %s35_s9 }
   0x5   :  { %s384_s14 = smov 8   ;;  %s385_s15 = smov [#allocation2]  }
   0x6   :  { %41 = dma.hbm_to_vmem [thread:$0]  %s34_s29, 512, %s36_s9, [#allocation6], %s383_s13, %s383_s13, %s384_s14  }
   0x7   :  { %s25_s16 = sshll.u32 %s385_s15, 4  ;;  %s48_s19 = sshll.u32 %s465_s3, 4  ;;  %s26_s16 = int_to_ptr.vmem [resolvable:$true] %s25_s16  ;;  %s49_s19 = int_to_ptr.hbm [resolvable:$true] %s48_s19 }
   0x8   :  { %28 = dma.hbm_to_vmem [thread:$0]  %s24_s12, 128, %s26_s16, [#allocation3]  }
   0x9   :  { %s63_s21 = sshll.u32 %s467_s5, 4  ;;  %s386_s22 = smov [#allocation7]   ;;  %s64_s21 = int_to_ptr.hbm [resolvable:$true] %s63_s21 }
   0xa   :  { %s50_s23 = sshll.u32 %s386_s22, 4  ;;  %s387_s0 = smov [#allocation8]   ;;  %s51_s23 = int_to_ptr.vmem [resolvable:$true] %s50_s23 }
   0xb   :  { %56 = dma.hbm_to_vmem [thread:$0]  %s49_s19, 2048, %s51_s23, [#allocation6], %s383_s13, %s383_s13, %s384_s14  }
   0xc   :  { %s65_s24 = sshll.u32 %s387_s0, 4  ;;  %s66_s24 = int_to_ptr.vmem [resolvable:$true] %s65_s24 }
   0xd   :  { %71 = dma.hbm_to_vmem [thread:$0]  %s64_s21, 2048, %s66_s24, [#allocation9], %s383_s13, %s383_s13, %s384_s14  }
   0xe   :  { %374 = dma.done.wait [#allocation3], 128  }
   0xf   :  { %375 = vsyncadd [#allocation3], 4294967168 }
  0x10   :  { %376 = dma.done.wait [#allocation6], 2560  }
  0x11   :  { %377 = vsyncadd [#allocation6], 4294964736 }
  0x12   :  { %378 = dma.done.wait [#allocation9], 2048  }
  0x13   :  { %379 = vsyncadd [#allocation9], 4294965248  ;;  %v94_v0 = vld [vmem:[#allocation5 + $0x18] sm:$0xff]  ;;  %v93_v1 = vld [vmem:[#allocation5 + $0x10] sm:$0xff]  ;;  %vm99_vm0 = vcmask 261120   ;;  %s388_s28 = smov 120  }
  0x14   :  { %115 = vmatpush.msra.mxu0 %v94_v0  ;;  %v139_v2 = vld [vmem:[#allocation7 + $0x78] sm:$0xff]  ;;  %v92_v3 = vld [vmem:[#allocation5 + $0x8] sm:$0xff]  ;;  %v138_v4 = vld [vmem:[#allocation7 + $0x70] sm:$0xff]  ;;  %s389_s29 = smov [#allocation10]   ;;  %vm209_vm1 = vcmask 7168  }
  0x15   :  { %144 = vmatpush.msra.mxu1 %v139_v2  ;;  %v137_v5 = vld [vmem:[#allocation7 + $0x68] sm:$0xff]  ;;  %v91_v6 = vld [vmem:[#allocation5] sm:$0xff]  ;;  %v90_v7 = vld [vmem:[#allocation2] sm:$0xff]  ;;  %s218_s30 = sshll.u32 %s389_s29, 4  ;;  %s219_s30 = int_to_ptr.vmem [resolvable:$true] %s218_s30 }
  0x16   :  { %116 = vmatpush.msra.mxu0 %v93_v1  ;;  %v136_v8 = vld [vmem:[#allocation7 + $0x60] sm:$0xff]  ;;  %v135_v9 = vld [vmem:[#allocation7 + $0x58] sm:$0xff]  ;;  %v134_v10 = vld [vmem:[#allocation7 + $0x50] sm:$0xff] }
  0x17   :  { %145 = vmatpush.msra.mxu1 %v138_v4  ;;  %v133_v11 = vld [vmem:[#allocation7 + $0x48] sm:$0xff]  ;;  %v132_v12 = vld [vmem:[#allocation7 + $0x40] sm:$0xff]  ;;  %v131_v13 = vld [vmem:[#allocation7 + $0x38] sm:$0xff] }
  0x18   :  { %117 = vmatpush.msra.mxu0 %v92_v3  ;;  %v130_v14 = vld [vmem:[#allocation7 + $0x30] sm:$0xff]  ;;  %v129_v15 = vld [vmem:[#allocation7 + $0x28] sm:$0xff]  ;;  %v128_v16 = vld [vmem:[#allocation7 + $0x20] sm:$0xff] }
  0x19   :  { %146 = vmatpush.msra.mxu1 %v137_v5  ;;  %v127_v17 = vld [vmem:[#allocation7 + $0x18] sm:$0xff]  ;;  %v126_v18 = vld [vmem:[#allocation7 + $0x10] sm:$0xff]  ;;  %v125_v19 = vld [vmem:[#allocation7 + $0x8] sm:$0xff] }
  0x1a   :  { %118 = vmatpush.msra.mxu0 %v91_v6  ;;  %v124_v20 = vld [vmem:[#allocation7] sm:$0xff]  ;;  %v180_v21 = vld [vmem:[#allocation8 + $0x78] sm:$0xff]  ;;  %v179_v22 = vld [vmem:[#allocation8 + $0x70] sm:$0xff] }
  0x1b   :  { %236 = vmatmul.msk.f32.vlgmr.msra.gmra.mxu0 %vm99_vm0, %v90_v7  ;;  %147 = vmatpush.msra.mxu1 %v136_v8  ;;  %v178_v23 = vld [vmem:[#allocation8 + $0x68] sm:$0xff]  ;;  %v177_v24 = vld [vmem:[#allocation8 + $0x60] sm:$0xff]  ;;  %v176_v25 = vld [vmem:[#allocation8 + $0x58] sm:$0xff] }
  0x1c   :  { %185 = vmatpush.msra.mxu2 %v180_v21  ;;  %v175_v26 = vld [vmem:[#allocation8 + $0x50] sm:$0xff]  ;;  %v174_v27 = vld [vmem:[#allocation8 + $0x48] sm:$0xff]  ;;  %v173_v28 = vld [vmem:[#allocation8 + $0x40] sm:$0xff] }
  0x1d   :  { %148 = vmatpush.msra.mxu1 %v135_v9  ;;  %v172_v29 = vld [vmem:[#allocation8 + $0x38] sm:$0xff]  ;;  %v171_v30 = vld [vmem:[#allocation8 + $0x30] sm:$0xff]  ;;  %v170_v31 = vld [vmem:[#allocation8 + $0x28] sm:$0xff] }
  0x1e   :  { %186 = vmatpush.msra.mxu2 %v179_v22  ;;  %v245_v32 = vld [vmem:[%s464_s2] ss:$0 sm:$0xff]  ;;  %v169_v36 = vld [vmem:[#allocation8 + $0x20] sm:$0xff]  ;;  %v167_v38 = vld [vmem:[#allocation8 + $0x10] sm:$0xff] }
  0x1f   :  { %149 = vmatpush.msra.mxu1 %v134_v10  ;;  %v168_v37 = vld [vmem:[#allocation8 + $0x18] sm:$0xff]  ;;  %v166_v39 = vld [vmem:[#allocation8 + $0x8] sm:$0xff]  ;;  %v165_v40 = vld [vmem:[#allocation8] sm:$0xff] }
  0x20   :  { %187 = vmatpush.msra.mxu2 %v178_v23  ;;  %v246_v41 = vld [vmem:[%s466_s4] ss:$0 sm:$0xff]  ;;  %s220_s4 = sshll.u32 %s469_s7, 4  ;;  %s221_s4 = int_to_ptr.hbm [resolvable:$true] %s220_s4 }
  0x21   :  { %150 = vmatpush.msra.mxu1 %v133_v11  ;;  %v247_v45 = vld [vmem:[%s468_s6] ss:$0 sm:$0xff] }
  0x22   :  { %188 = vmatpush.msra.mxu2 %v177_v24 }
  0x23   :  { %151 = vmatpush.msra.mxu1 %v132_v12 }
  0x24   :  { %189 = vmatpush.msra.mxu2 %v176_v25 }
  0x25   :  { %152 = vmatpush.msra.mxu1 %v131_v13 }
  0x26   :  { %190 = vmatpush.msra.mxu2 %v175_v26 }
  0x27   :  { %153 = vmatpush.msra.mxu1 %v130_v14 }
  0x28   :  { %191 = vmatpush.msra.mxu2 %v174_v27 }
  0x29   :  { %154 = vmatpush.msra.mxu1 %v129_v15 }
  0x2a   :  { %192 = vmatpush.msra.mxu2 %v173_v28 }
  0x2b   :  { %155 = vmatpush.msra.mxu1 %v128_v16 }
  0x2c   :  { %193 = vmatpush.msra.mxu2 %v172_v29 }
  0x2d   :  { %156 = vmatpush.msra.mxu1 %v127_v17 }
  0x2e   :  { %194 = vmatpush.msra.mxu2 %v171_v30 }
  0x2f   :  { %157 = vmatpush.msra.mxu1 %v126_v18 }
  0x30   :  { %195 = vmatpush.msra.mxu2 %v170_v31 }
  0x31   :  { %158 = vmatpush.msra.mxu1 %v125_v19 }
  0x32   :  { %196 = vmatpush.msra.mxu2 %v169_v36 }
  0x33   :  { %159 = vmatpush.msra.mxu1 %v124_v20 }
  0x34   :  { %197 = vmatpush.msra.mxu2 %v168_v37 }
  0x36   :  { %198 = vmatpush.msra.mxu2 %v167_v38 }
  0x38   :  { %199 = vmatpush.msra.mxu2 %v166_v39 }
  0x3a   :  { %200 = vmatpush.msra.mxu2 %v165_v40 }
  0x98   :  { %v120_v33 = vpop.f32.mrf.mxu0 }
  0x99   :  { %v121_v34 = vadd.f32 %v245_v32, %v120_v33 }
  0x9b   :  { %248 = vtanh.f32 %v121_v34 }
  0xa1   :  { %v249_v35 = vpop.eup %248 }
  0xa2   :  { %160 = vmatmul.f32.vlgmr.msra.gmra.mxu1 %v249_v35 }
 0x11f   :  { %v161_v42 = vpop.f32.mrf.mxu1 }
 0x120   :  { %v162_v43 = vadd.f32 %v246_v41, %v161_v42 }
 0x122   :  { %250 = vtanh.f32 %v162_v43 }
 0x128   :  { %v251_v44 = vpop.eup %250 }
 0x129   :  { %201 = vmatmul.f32.vlgmr.msra.gmra.mxu2 %v251_v44 }
 0x1ac   :  { %v202_v46 = vpop.f32.mrf.mxu2 }
 0x1ad   :  { %v203_v47 = vadd.f32 %v247_v45, %v202_v46 }
 0x1af   :  { %252 = vtanh.f32 %v203_v47  ;;  %206 = vrot.lane.b32.xlu0 %v203_v47, %s388_s28 }
 0x1b5   :  { %v253_v48 = vpop.eup %252 }
 0x1b6   :  { %212 = vst [vmem:[#allocation10] sm:$0xff] %v253_v48 }
 0x1b7   :  { %223 = dma.vmem_to_hbm [thread:$0]  %s219_s30, 128, %s221_s4, [#allocation4]  }
 0x221   :  { %v207_v49 = vpop.permute.xlu0 %206 }
 0x222   :  { %210 = vst.msk [vmem:[%s470_s8] sm:$0xff] %vm209_vm1, %v207_v49 }
 0x223   :  { %380 = dma.done.wait [#allocation4], 128  }
 0x224   :  { %381 = vsyncadd [#allocation4], 4294967168 }
 0x225   :  { %232 = vsyncpa [#allocation3], 1 }
 0x226   :  { %233 = vsyncpa [#allocation6], 1 }
 0x227   :  { %234 = vsyncpa [#allocation9], 1 }
 0x228   :  { %235 = vsyncpa [#allocation4], 1 }

</bundles_post_ra>
